<compile_context>
chip_gen: v7x
topology: tpu7x:2x2x1
jax: 0.10.0
libtpu: 0.0.40
codegen_flags: <defaults>
</compile_context>

<pallas_src>
import jax
import jax.numpy as jnp
from jax.experimental import pallas as pl
from jax.experimental.pallas import tpu as pltpu

input_size = 1
hidden_size = 10
output_size = 1

LANES = 1024       # lane (last-axis) width of the 2D batch slab
ROW_TILE = 512     # sublane rows per grid step -> 512*1024*4 B = 2 MiB x-block


def _round_up(n, m):
    return pl.cdiv(n, m) * m


def mlp_kernel(params_ref, x_ref, o_ref):
    # params_ref: SMEM f32[3*hidden + 1] = [w1(10) | b1(10) | w2(10) | b2(1)]
    # x_ref / o_ref: VMEM f32 (row_tile, lanes) blocks of the batch slab.
    x = x_ref[...]
    # Accumulator starts at b2 (scalar SMEM read -> vsplat); saves the final add.
    acc = jnp.full(x.shape, params_ref[3 * hidden_size], dtype=x.dtype)
    # Short static unroll over hidden units: pure VPU work, ~5 ops/elem/unit,
    # live set is only {x, acc} per chunk.
    for j in range(hidden_size):
        w1j = params_ref[j]
        b1j = params_ref[hidden_size + j]
        w2j = params_ref[2 * hidden_size + j]
        acc = acc + w2j * jnp.maximum(w1j * x + b1j, 0.0)
    o_ref[...] = acc


def simple_net_forward(x, w1, b1, w2, b2):
    """x: (B, 1) f32; w1: (10, 1); b1: (10,); w2: (1, 10); b2: (1,).
    Returns (B, 1) f32 = fc2(relu(fc1(x)))."""
    B = x.shape[0]
    assert x.shape == (B, input_size) and input_size == 1 and output_size == 1

    # ---- layout: flat batch -> dense (rows, C) slab (reshape only, no .T) ----
    x_flat = x.reshape(-1)                              # (B,)
    C = min(LANES, _round_up(B, 128))                   # lane-dense, adapts for tiny B
    rows = pl.cdiv(B, C)
    r_tile = min(ROW_TILE, _round_up(rows, 8))          # always a multiple of 8
    rows_pad = _round_up(rows, r_tile)
    total = rows_pad * C
    if total != B:
        # Tail-only pad (bounded by ~one tile, independent of B); skipped when
        # the batch already fills the slab exactly.
        x_flat = jnp.pad(x_flat, (0, total - B))
    x2d = x_flat.reshape(rows_pad, C)

    # ---- pack the 31 scalar parameters into one SMEM operand ----
    params = jnp.concatenate(
        [w1.reshape(-1), b1.reshape(-1), w2.reshape(-1), b2.reshape(-1)]
    ).astype(jnp.float32)

    n_tiles = rows_pad // r_tile   # at large B this is >= 2 (both v7x TCs busy)

    out2d = pl.pallas_call(
        mlp_kernel,
        out_shape=jax.ShapeDtypeStruct((rows_pad, C), jnp.float32),
        grid=(n_tiles,),
        in_specs=[
            pl.BlockSpec(memory_space=pltpu.MemorySpace.SMEM),   # packed params
            pl.BlockSpec((r_tile, C), lambda i: (i, 0)),         # x block
        ],
        out_specs=pl.BlockSpec((r_tile, C), lambda i: (i, 0)),
        compiler_params=pltpu.CompilerParams(
            dimension_semantics=("parallel",),
            vmem_limit_bytes=32 * 1024 * 1024,
        ),
    )(params, x2d)

    return out2d.reshape(-1)[:B].reshape(B, output_size)


def init_params(key):
    """Deterministic init mimicking nn.Linear's uniform(-1/sqrt(fan_in), 1/sqrt(fan_in))."""
    k1, k2, k3, k4 = jax.random.split(key, 4)
    bound1 = 1.0 / jnp.sqrt(jnp.float32(input_size))
    bound2 = 1.0 / jnp.sqrt(jnp.float32(hidden_size))
    w1 = jax.random.uniform(k1, (hidden_size, input_size), jnp.float32, -bound1, bound1)
    b1 = jax.random.uniform(k2, (hidden_size,), jnp.float32, -bound1, bound1)
    w2 = jax.random.uniform(k3, (output_size, hidden_size), jnp.float32, -bound2, bound2)
    b2 = jax.random.uniform(k4, (output_size,), jnp.float32, -bound2, bound2)
    return w1, b1, w2, b2


def _reference(x, w1, b1, w2, b2):
    return jnp.maximum(x @ w1.T + b1, 0.0) @ w2.T + b2


if __name__ == "__main__":
    key = jax.random.PRNGKey(0)
    kp, kx1, kx2, kx3 = jax.random.split(key, 4)
    w1, b1, w2, b2 = init_params(kp)

    # B=8: module-consistent small shape (single minimal (8,128) block).
    # B=1000: ragged lane padding, single (8,1024) block.
    # B=600000: multi-step parallel grid (two 2 MiB row tiles) + tail padding.
    for B, kx in ((8, kx1), (1000, kx2), (600_000, kx3)):
        xb = jax.random.normal(kx, (B, input_size), jnp.float32)
        out = jax.block_until_ready(simple_net_forward(xb, w1, b1, w2, b2))
        ref = _reference(xb, w1, b1, w2, b2)
        assert out.shape == (B, output_size)
        assert jnp.allclose(out, ref, atol=1e-5, rtol=1e-5), f"mismatch at B={B}"

    print("KERNEL_OK")
</pallas_src>

<mosaic_0001>
module attributes {stable_mosaic.version = 11 : i64} {
  func.func @mlp_kernel(%arg0: i32, %arg1: memref<31xf32, #tpu.memory_space<smem>>, %arg2: memref<8x128xf32, #tpu.memory_space<vmem>>, %arg3: memref<8x128xf32, #tpu.memory_space<vmem>>) attributes {dimension_semantics = [#tpu.dimension_semantics<parallel>], iteration_bounds = array<i64: 1>, scalar_prefetch = 0 : i64, scratch_operands = 0 : i64, tpu.core_type = #tpu.core_type<tc>, window_params = [{transform_indices = @transform_0, window_bounds = array<i64: 31>}, {transform_indices = @transform_1, window_bounds = array<i64: 8, 128>}, {transform_indices = @transform_2, window_bounds = array<i64: 8, 128>}]} {
    %c0 = arith.constant 0 : index
    %c0_0 = arith.constant 0 : index
    %0 = vector.load %arg2[%c0, %c0_0] : memref<8x128xf32, #tpu.memory_space<vmem>>, vector<8x128xf32>
    %c30 = arith.constant 30 : index
    %1 = memref.load %arg1[%c30] : memref<31xf32, #tpu.memory_space<smem>>
    %2 = vector.broadcast %1 : f32 to vector<8x128xf32>
    %c0_1 = arith.constant 0 : index
    %3 = memref.load %arg1[%c0_1] : memref<31xf32, #tpu.memory_space<smem>>
    %c10 = arith.constant 10 : index
    %4 = memref.load %arg1[%c10] : memref<31xf32, #tpu.memory_space<smem>>
    %c20 = arith.constant 20 : index
    %5 = memref.load %arg1[%c20] : memref<31xf32, #tpu.memory_space<smem>>
    %6 = vector.broadcast %3 : f32 to vector<8x128xf32>
    %7 = arith.mulf %6, %0 : vector<8x128xf32>
    %8 = vector.broadcast %4 : f32 to vector<8x128xf32>
    %9 = arith.addf %7, %8 : vector<8x128xf32>
    %cst = arith.constant 0.000000e+00 : f32
    %10 = vector.broadcast %cst : f32 to vector<8x128xf32>
    %11 = arith.maximumf %9, %10 : vector<8x128xf32>
    %12 = vector.broadcast %5 : f32 to vector<8x128xf32>
    %13 = arith.mulf %12, %11 : vector<8x128xf32>
    %14 = arith.addf %2, %13 : vector<8x128xf32>
    %c1 = arith.constant 1 : index
    %15 = memref.load %arg1[%c1] : memref<31xf32, #tpu.memory_space<smem>>
    %c11 = arith.constant 11 : index
    %16 = memref.load %arg1[%c11] : memref<31xf32, #tpu.memory_space<smem>>
    %c21 = arith.constant 21 : index
    %17 = memref.load %arg1[%c21] : memref<31xf32, #tpu.memory_space<smem>>
    %18 = vector.broadcast %15 : f32 to vector<8x128xf32>
    %19 = arith.mulf %18, %0 : vector<8x128xf32>
    %20 = vector.broadcast %16 : f32 to vector<8x128xf32>
    %21 = arith.addf %19, %20 : vector<8x128xf32>
    %cst_2 = arith.constant 0.000000e+00 : f32
    %22 = vector.broadcast %cst_2 : f32 to vector<8x128xf32>
    %23 = arith.maximumf %21, %22 : vector<8x128xf32>
    %24 = vector.broadcast %17 : f32 to vector<8x128xf32>
    %25 = arith.mulf %24, %23 : vector<8x128xf32>
    %26 = arith.addf %14, %25 : vector<8x128xf32>
    %c2 = arith.constant 2 : index
    %27 = memref.load %arg1[%c2] : memref<31xf32, #tpu.memory_space<smem>>
    %c12 = arith.constant 12 : index
    %28 = memref.load %arg1[%c12] : memref<31xf32, #tpu.memory_space<smem>>
    %c22 = arith.constant 22 : index
    %29 = memref.load %arg1[%c22] : memref<31xf32, #tpu.memory_space<smem>>
    %30 = vector.broadcast %27 : f32 to vector<8x128xf32>
    %31 = arith.mulf %30, %0 : vector<8x128xf32>
    %32 = vector.broadcast %28 : f32 to vector<8x128xf32>
    %33 = arith.addf %31, %32 : vector<8x128xf32>
    %cst_3 = arith.constant 0.000000e+00 : f32
    %34 = vector.broadcast %cst_3 : f32 to vector<8x128xf32>
    %35 = arith.maximumf %33, %34 : vector<8x128xf32>
    %36 = vector.broadcast %29 : f32 to vector<8x128xf32>
    %37 = arith.mulf %36, %35 : vector<8x128xf32>
    %38 = arith.addf %26, %37 : vector<8x128xf32>
    %c3 = arith.constant 3 : index
    %39 = memref.load %arg1[%c3] : memref<31xf32, #tpu.memory_space<smem>>
    %c13 = arith.constant 13 : index
    %40 = memref.load %arg1[%c13] : memref<31xf32, #tpu.memory_space<smem>>
    %c23 = arith.constant 23 : index
    %41 = memref.load %arg1[%c23] : memref<31xf32, #tpu.memory_space<smem>>
    %42 = vector.broadcast %39 : f32 to vector<8x128xf32>
    %43 = arith.mulf %42, %0 : vector<8x128xf32>
    %44 = vector.broadcast %40 : f32 to vector<8x128xf32>
    %45 = arith.addf %43, %44 : vector<8x128xf32>
    %cst_4 = arith.constant 0.000000e+00 : f32
    %46 = vector.broadcast %cst_4 : f32 to vector<8x128xf32>
    %47 = arith.maximumf %45, %46 : vector<8x128xf32>
    %48 = vector.broadcast %41 : f32 to vector<8x128xf32>
    %49 = arith.mulf %48, %47 : vector<8x128xf32>
    %50 = arith.addf %38, %49 : vector<8x128xf32>
    %c4 = arith.constant 4 : index
    %51 = memref.load %arg1[%c4] : memref<31xf32, #tpu.memory_space<smem>>
    %c14 = arith.constant 14 : index
    %52 = memref.load %arg1[%c14] : memref<31xf32, #tpu.memory_space<smem>>
    %c24 = arith.constant 24 : index
    %53 = memref.load %arg1[%c24] : memref<31xf32, #tpu.memory_space<smem>>
    %54 = vector.broadcast %51 : f32 to vector<8x128xf32>
    %55 = arith.mulf %54, %0 : vector<8x128xf32>
    %56 = vector.broadcast %52 : f32 to vector<8x128xf32>
    %57 = arith.addf %55, %56 : vector<8x128xf32>
    %cst_5 = arith.constant 0.000000e+00 : f32
    %58 = vector.broadcast %cst_5 : f32 to vector<8x128xf32>
    %59 = arith.maximumf %57, %58 : vector<8x128xf32>
    %60 = vector.broadcast %53 : f32 to vector<8x128xf32>
    %61 = arith.mulf %60, %59 : vector<8x128xf32>
    %62 = arith.addf %50, %61 : vector<8x128xf32>
    %c5 = arith.constant 5 : index
    %63 = memref.load %arg1[%c5] : memref<31xf32, #tpu.memory_space<smem>>
    %c15 = arith.constant 15 : index
    %64 = memref.load %arg1[%c15] : memref<31xf32, #tpu.memory_space<smem>>
    %c25 = arith.constant 25 : index
    %65 = memref.load %arg1[%c25] : memref<31xf32, #tpu.memory_space<smem>>
    %66 = vector.broadcast %63 : f32 to vector<8x128xf32>
    %67 = arith.mulf %66, %0 : vector<8x128xf32>
    %68 = vector.broadcast %64 : f32 to vector<8x128xf32>
    %69 = arith.addf %67, %68 : vector<8x128xf32>
    %cst_6 = arith.constant 0.000000e+00 : f32
    %70 = vector.broadcast %cst_6 : f32 to vector<8x128xf32>
    %71 = arith.maximumf %69, %70 : vector<8x128xf32>
    %72 = vector.broadcast %65 : f32 to vector<8x128xf32>
    %73 = arith.mulf %72, %71 : vector<8x128xf32>
    %74 = arith.addf %62, %73 : vector<8x128xf32>
    %c6 = arith.constant 6 : index
    %75 = memref.load %arg1[%c6] : memref<31xf32, #tpu.memory_space<smem>>
    %c16 = arith.constant 16 : index
    %76 = memref.load %arg1[%c16] : memref<31xf32, #tpu.memory_space<smem>>
    %c26 = arith.constant 26 : index
    %77 = memref.load %arg1[%c26] : memref<31xf32, #tpu.memory_space<smem>>
    %78 = vector.broadcast %75 : f32 to vector<8x128xf32>
    %79 = arith.mulf %78, %0 : vector<8x128xf32>
    %80 = vector.broadcast %76 : f32 to vector<8x128xf32>
    %81 = arith.addf %79, %80 : vector<8x128xf32>
    %cst_7 = arith.constant 0.000000e+00 : f32
    %82 = vector.broadcast %cst_7 : f32 to vector<8x128xf32>
    %83 = arith.maximumf %81, %82 : vector<8x128xf32>
    %84 = vector.broadcast %77 : f32 to vector<8x128xf32>
    %85 = arith.mulf %84, %83 : vector<8x128xf32>
    %86 = arith.addf %74, %85 : vector<8x128xf32>
    %c7 = arith.constant 7 : index
    %87 = memref.load %arg1[%c7] : memref<31xf32, #tpu.memory_space<smem>>
    %c17 = arith.constant 17 : index
    %88 = memref.load %arg1[%c17] : memref<31xf32, #tpu.memory_space<smem>>
    %c27 = arith.constant 27 : index
    %89 = memref.load %arg1[%c27] : memref<31xf32, #tpu.memory_space<smem>>
    %90 = vector.broadcast %87 : f32 to vector<8x128xf32>
    %91 = arith.mulf %90, %0 : vector<8x128xf32>
    %92 = vector.broadcast %88 : f32 to vector<8x128xf32>
    %93 = arith.addf %91, %92 : vector<8x128xf32>
    %cst_8 = arith.constant 0.000000e+00 : f32
    %94 = vector.broadcast %cst_8 : f32 to vector<8x128xf32>
    %95 = arith.maximumf %93, %94 : vector<8x128xf32>
    %96 = vector.broadcast %89 : f32 to vector<8x128xf32>
    %97 = arith.mulf %96, %95 : vector<8x128xf32>
    %98 = arith.addf %86, %97 : vector<8x128xf32>
    %c8 = arith.constant 8 : index
    %99 = memref.load %arg1[%c8] : memref<31xf32, #tpu.memory_space<smem>>
    %c18 = arith.constant 18 : index
    %100 = memref.load %arg1[%c18] : memref<31xf32, #tpu.memory_space<smem>>
    %c28 = arith.constant 28 : index
    %101 = memref.load %arg1[%c28] : memref<31xf32, #tpu.memory_space<smem>>
    %102 = vector.broadcast %99 : f32 to vector<8x128xf32>
    %103 = arith.mulf %102, %0 : vector<8x128xf32>
    %104 = vector.broadcast %100 : f32 to vector<8x128xf32>
    %105 = arith.addf %103, %104 : vector<8x128xf32>
    %cst_9 = arith.constant 0.000000e+00 : f32
    %106 = vector.broadcast %cst_9 : f32 to vector<8x128xf32>
    %107 = arith.maximumf %105, %106 : vector<8x128xf32>
    %108 = vector.broadcast %101 : f32 to vector<8x128xf32>
    %109 = arith.mulf %108, %107 : vector<8x128xf32>
    %110 = arith.addf %98, %109 : vector<8x128xf32>
    %c9 = arith.constant 9 : index
    %111 = memref.load %arg1[%c9] : memref<31xf32, #tpu.memory_space<smem>>
    %c19 = arith.constant 19 : index
    %112 = memref.load %arg1[%c19] : memref<31xf32, #tpu.memory_space<smem>>
    %c29 = arith.constant 29 : index
    %113 = memref.load %arg1[%c29] : memref<31xf32, #tpu.memory_space<smem>>
    %114 = vector.broadcast %111 : f32 to vector<8x128xf32>
    %115 = arith.mulf %114, %0 : vector<8x128xf32>
    %116 = vector.broadcast %112 : f32 to vector<8x128xf32>
    %117 = arith.addf %115, %116 : vector<8x128xf32>
    %cst_10 = arith.constant 0.000000e+00 : f32
    %118 = vector.broadcast %cst_10 : f32 to vector<8x128xf32>
    %119 = arith.maximumf %117, %118 : vector<8x128xf32>
    %120 = vector.broadcast %113 : f32 to vector<8x128xf32>
    %121 = arith.mulf %120, %119 : vector<8x128xf32>
    %122 = arith.addf %110, %121 : vector<8x128xf32>
    %c0_11 = arith.constant 0 : index
    %c0_12 = arith.constant 0 : index
    %123 = vector.load %arg3[%c0_11, %c0_12] : memref<8x128xf32, #tpu.memory_space<vmem>>, vector<8x128xf32>
    tpu.vector_store %arg3[%c0_11, %c0_12], %122 {strides = array<i32>} : memref<8x128xf32, #tpu.memory_space<vmem>>, vector<8x128xf32>,
    return
  }
  func.func @transform_0(%arg0: i32) -> i32 {
    %c0_i32 = arith.constant 0 : i32
    %c0_i32_0 = arith.constant 0 : i32
    return %c0_i32 : i32
  }
  func.func @transform_1(%arg0: i32) -> (i32, i32) {
    %c0_i32 = arith.constant 0 : i32
    %c0_i32_0 = arith.constant 0 : i32
    return %arg0, %c0_i32 : i32, i32
  }
  func.func @transform_2(%arg0: i32) -> (i32, i32) {
    %c0_i32 = arith.constant 0 : i32
    %c0_i32_0 = arith.constant 0 : i32
    return %arg0, %c0_i32 : i32, i32
  }
}

</mosaic_0001>

<bundles_post_ra>
// kernel: tpu_custom_call.1
= control target key start
LH: loop header
LB: loop body
LE: loop exit
PB: predicated region body
PF: predicated region fallthrough
CT: control target
= control target key end

     0   :  { %7 = vsyncpa [#allocation5], 0  ;;  %s402_s0 = inlined_call_operand.hbm [shape: f32[31], index: 0, kind: input, shape index: {}]   ;;  %s403_s1 = inlined_call_operand.hbm [shape: f32[8,128], index: 1, kind: input, shape index: {}]   ;;  %s404_s2 = inlined_call_operand.hbm [shape: f32[8,128], index: 2, kind: output, shape index: {}]  }
   0x1   :  { %8 = vsyncpa [#allocation3], 0 }
   0x2   :  { %9 = vsyncpa [#allocation4], 0  ;;  %s198_s11 = scalar_lea.hbm %s402_s0, 16 }
   0x3   :  { %p199_p0 = scmp.ne.s32.totalorder %s402_s0, %s198_s11  ;;  %p202_p1 = scmp.lt.u32.totalorder %s198_s11, %s402_s0 }
   0x5   :  { %p204_p2 = pnand %p202_p1, %p199_p0 }
   0x7   :  { %207 = shalt.err (!%p204_p2)
}
   0x8   :  { %s258_s16 = smov [#allocation2]   ;;  %s259_s19 = smov [#allocation6]  }
   0x9   :  { %17 = dma.hbm_to_smem %s402_s0, 16, %s258_s16, [#allocation5]  }
   0xa   :  { %s24_s20 = sshll.u32 %s259_s19, 4  ;;  %s208_s23 = scalar_lea.hbm %s403_s1, 128  ;;  %s25_s20 = int_to_ptr.vmem [resolvable:$true] %s24_s20 }
   0xb   :  { %p209_p3 = scmp.ne.s32.totalorder %s403_s1, %s208_s23  ;;  %p212_p4 = scmp.lt.u32.totalorder %s208_s23, %s403_s1 }
   0xd   :  { %p214_p5 = pnand %p212_p4, %p209_p3 }
   0xf   :  { %217 = shalt.err (!%p214_p5)
}
  0x10   :  { %s218_s28 = scalar_lea.vmem %s25_s20, 128  ;;  %p223_p7 = scmp.lt.s32.totalorder %s25_s20, %s25_s20 }
  0x11   :  { %p219_p6 = scmp.ne.s32.totalorder %s25_s20, %s218_s28  ;;  %p224_p8 = scmp.lt.s32.totalorder %s218_s28, %s218_s28 }
  0x13   :  { %p225_p9 = por %p224_p8, %p223_p7 }
  0x15   :  { %p226_p10 = pnand %p225_p9, %p219_p6 }
  0x17   :  { %229 = shalt.err (!%p226_p10)
}
  0x18   :  { %27 = dma.hbm_to_vmem [thread:$0]  %s403_s1, 128, %s25_s20, [#allocation3]  }
  0x19   :  { %252 = dma.done.wait [#allocation5], 16  }
  0x1a   :  { %253 = vsyncadd [#allocation5], 4294967280 }
  0x1b   :  { %254 = dma.done.wait [#allocation3], 128  }
  0x1c   :  { %255 = vsyncadd [#allocation3], 4294967168 }
  0x1d   :  { %34 = sfence }
  0x1e   :  { %s300_s30 = sld [smem:[#allocation2 + $0x1e]]  ;;  %s38_s3 = sld [smem:[#allocation2]]  ;;  %v308_v0 = vld [vmem:[#allocation6] sm:$0xff] }
  0x1f   :  { %s166_s4 = sld [smem:[#allocation2 + $0xa]]  ;;  %s302_s5 = sld [smem:[#allocation2 + $0x14]] }
  0x20   :  { %s168_s6 = sld [smem:[#allocation2 + $0x1]]  ;;  %s304_s7 = sld [smem:[#allocation2 + $0xb]] }
  0x21   :  { %s306_s8 = sld [smem:[#allocation2 + $0x15]]  ;;  %s171_s9 = sld [smem:[#allocation2 + $0x2]] }
  0x22   :  { %s310_s1 = sld [smem:[#allocation2 + $0xc]]  ;;  %s312_s10 = sld [smem:[#allocation2 + $0x16]] }
  0x23   :  { %s314_s11 = sld [smem:[#allocation2 + $0x3]]  ;;  %s316_s12 = sld [smem:[#allocation2 + $0xd]] }
  0x24   :  { %v41_v1 = vstv %s38_s3  ;;  %s318_s13 = sld [smem:[#allocation2 + $0x17]]  ;;  %s320_s14 = sld [smem:[#allocation2 + $0x4]]  ;;  %v37_v6 = vstv %s300_s30 }
  0x25   :  { %v42_v2 = vmul.f32 %v41_v1, %v308_v0  ;;  %v43_v3 = vstv %s166_s4  ;;  %s323_s15 = sld [smem:[#allocation2 + $0xe]]  ;;  %s325_s16 = sld [smem:[#allocation2 + $0x18]]  ;;  %v46_v10 = vstv %s302_s5 }
  0x26   :  { %v52_v4 = vstv %s168_s6  ;;  %v54_v5 = vstv %s304_s7  ;;  %s328_s17 = sld [smem:[#allocation2 + $0x5]]  ;;  %s330_s18 = sld [smem:[#allocation2 + $0xf]] }
  0x27   :  { %v44_v7 = vadd.f32 %v43_v3, %v42_v2  ;;  %v53_v8 = vmul.f32 %v52_v4, %v308_v0  ;;  %v63_v9 = vstv %s171_s9  ;;  %s334_s19 = sld [smem:[#allocation2 + $0x6]]  ;;  %v57_v11 = vstv %s306_s8  ;;  %s340_s20 = sld [smem:[#allocation2 + $0x19]] }
  0x28   :  { %v64_v12 = vmul.f32 %v63_v9, %v308_v0  ;;  %v65_v13 = vstv %s310_s1  ;;  %s342_s21 = sld [smem:[#allocation2 + $0x10]]  ;;  %s346_s22 = sld [smem:[#allocation2 + $0x7]]  ;;  %v68_v19 = vstv %s312_s10 }
  0x29   :  { %v45_v14 = vmax.f32 %v44_v7, 0.0  ;;  %v55_v15 = vadd.f32 %v54_v5, %v53_v8  ;;  %v74_v16 = vstv %s314_s11  ;;  %v76_v17 = vstv %s316_s12  ;;  %s351_s23 = sld [smem:[#allocation2 + $0x1a]]  ;;  %s353_s24 = sld [smem:[#allocation2 + $0x11]] }
  0x2a   :  { %v66_v18 = vadd.f32 %v65_v13, %v64_v12  ;;  %v75_v20 = vmul.f32 %v74_v16, %v308_v0  ;;  %v85_v21 = vstv %s320_s14  ;;  %s357_s25 = sld [smem:[#allocation2 + $0x8]]  ;;  %s359_s26 = sld [smem:[#allocation2 + $0x12]]  ;;  %v79_v28 = vstv %s318_s13 }
  0x2b   :  { %v47_v22 = vmul.f32 %v46_v10, %v45_v14  ;;  %v56_v23 = vmax.f32 %v55_v15, 0.0  ;;  %v86_v24 = vmul.f32 %v85_v21, %v308_v0  ;;  %v87_v25 = vstv %s323_s15  ;;  %s363_s27 = sld [smem:[#allocation2 + $0x1b]]  ;;  %s366_s28 = sld [smem:[#allocation2 + $0x9]] }
  0x2c   :  { %v67_v26 = vmax.f32 %v66_v18, 0.0  ;;  %v77_v27 = vadd.f32 %v76_v17, %v75_v20  ;;  %v96_v29 = vstv %s328_s17  ;;  %s368_s0 = sld [smem:[#allocation2 + $0x13]]  ;;  %v90_v36 = vstv %s325_s16  ;;  %s373_s29 = sld [smem:[#allocation2 + $0x1c]] }
  0x2d   :  { %v48_v30 = vadd.f32 %v47_v22, %v37_v6  ;;  %v58_v31 = vmul.f32 %v57_v11, %v56_v23  ;;  %v88_v32 = vadd.f32 %v87_v25, %v86_v24  ;;  %v97_v33 = vmul.f32 %v96_v29, %v308_v0  ;;  %s194_s30 = sld [smem:[#allocation2 + $0x1d]]  ;;  %s260_s3 = smov [#allocation7]  }
  0x2e   :  { %v69_v34 = vmul.f32 %v68_v19, %v67_v26  ;;  %v78_v35 = vmax.f32 %v77_v27, 0.0  ;;  %v98_v37 = vstv %s330_s18  ;;  %v107_v41 = vstv %s334_s19  ;;  %s155_s4 = sshll.u32 %s260_s3, 4  ;;  %s156_s4 = int_to_ptr.vmem [resolvable:$true] %s155_s4 }
  0x2f   :  { %v59_v38 = vadd.f32 %v58_v31, %v48_v30  ;;  %v89_v39 = vmax.f32 %v88_v32, 0.0  ;;  %v99_v40 = vadd.f32 %v98_v37, %v97_v33  ;;  %v101_v43 = vstv %s340_s20  ;;  %s230_s5 = scalar_lea.vmem %s156_s4, 128  ;;  %p235_p12 = scmp.lt.s32.totalorder %s156_s4, %s156_s4 }
  0x30   :  { %v80_v42 = vmul.f32 %v79_v28, %v78_v35  ;;  %v108_v44 = vmul.f32 %v107_v41, %v308_v0  ;;  %v109_v45 = vstv %s342_s21  ;;  %v118_v49 = vstv %s346_s22  ;;  %p231_p11 = scmp.ne.s32.totalorder %s156_s4, %s230_s5  ;;  %p236_p13 = scmp.lt.s32.totalorder %s230_s5, %s230_s5 }
  0x31   :  { %v70_v46 = vadd.f32 %v69_v34, %v59_v38  ;;  %v91_v47 = vmul.f32 %v90_v36, %v89_v39  ;;  %v100_v48 = vmax.f32 %v99_v40, 0.0  ;;  %v112_v51 = vstv %s351_s23 }
  0x32   :  { %v110_v50 = vadd.f32 %v109_v45, %v108_v44  ;;  %v119_v52 = vmul.f32 %v118_v49, %v308_v0  ;;  %v120_v53 = vstv %s353_s24  ;;  %v129_v56 = vstv %s357_s25  ;;  %p237_p0 = por %p236_p13, %p235_p12 }
  0x33   :  { %v81_v54 = vadd.f32 %v80_v42, %v70_v46  ;;  %v102_v55 = vmul.f32 %v101_v43, %v100_v48  ;;  %v131_v57 = vstv %s359_s26  ;;  %v130_v60 = vmul.f32 %v129_v56, %v308_v0 }
  0x34   :  { %v111_v58 = vmax.f32 %v110_v50, 0.0  ;;  %v121_v59 = vadd.f32 %v120_v53, %v119_v52  ;;  %v123_v62 = vstv %s363_s27  ;;  %v140_v63 = vstv %s366_s28  ;;  %p238_p1 = pnand %p237_p0, %p231_p11 }
  0x35   :  { %v92_v61 = vadd.f32 %v91_v47, %v81_v54  ;;  %v142_v1 = vstv %s368_s0  ;;  %v132_v4 = vadd.f32 %v131_v57, %v130_v60  ;;  %v141_v5 = vmul.f32 %v140_v63, %v308_v0 }
  0x36   :  { %v113_v2 = vmul.f32 %v112_v51, %v111_v58  ;;  %v122_v3 = vmax.f32 %v121_v59, 0.0  ;;  %v134_v7 = vstv %s373_s29  ;;  %v145_v12 = vstv %s194_s30 }
  0x37   :  { %v103_v6 = vadd.f32 %v102_v55, %v92_v61  ;;  %v133_v9 = vmax.f32 %v132_v4, 0.0  ;;  %v143_v10 = vadd.f32 %v142_v1, %v141_v5 }
  0x38   :  { %v124_v8 = vmul.f32 %v123_v62, %v122_v3 }
  0x39   :  { %v114_v11 = vadd.f32 %v113_v2, %v103_v6  ;;  %v135_v13 = vmul.f32 %v134_v7, %v133_v9  ;;  %v144_v14 = vmax.f32 %v143_v10, 0.0 }
  0x3b   :  { %v125_v15 = vadd.f32 %v124_v8, %v114_v11  ;;  %v146_v16 = vmul.f32 %v145_v12, %v144_v14 }
  0x3d   :  { %v136_v17 = vadd.f32 %v135_v13, %v125_v15 }
  0x3f   :  { %v147_v18 = vadd.f32 %v146_v16, %v136_v17 }
  0x41   :  { %148 = vst [vmem:[#allocation7] sm:$0xff] %v147_v18 }
  0x42   :  { %241 = shalt.err (!%p238_p1)
}
  0x43   :  { %s242_s8 = scalar_lea.hbm %s404_s2, 128 }
  0x44   :  { %p243_p2 = scmp.ne.s32.totalorder %s404_s2, %s242_s8  ;;  %p246_p3 = scmp.lt.u32.totalorder %s242_s8, %s404_s2 }
  0x46   :  { %p248_p4 = pnand %p246_p3, %p243_p2 }
  0x48   :  { %251 = shalt.err (!%p248_p4)
}
  0x49   :  { %158 = dma.vmem_to_hbm [thread:$0]  %s156_s4, 128, %s404_s2, [#allocation4]  }
  0x4a   :  { %256 = dma.done.wait [#allocation4], 128  }
  0x4b   :  { %257 = vsyncadd [#allocation4], 4294967168 }
  0x4c   :  { %162 = vsyncpa [#allocation3], 1 }
  0x4d   :  { %163 = vsyncpa [#allocation4], 1 }
  0x4e   :  { %164 = vsyncpa [#allocation5], 1 }

</bundles_post_ra>
